<compile_context>
chip_gen: v7x
topology: tpu7x:2x2x1
jax: 0.10.0
libtpu: 0.0.40
codegen_flags: <defaults>
</compile_context>

<pallas_src>
import jax
import jax.numpy as jnp
from jax.experimental import pallas as pl
from jax.experimental.pallas import tpu as pltpu


# ---------------------------------------------------------------------------
# Fused kernel builder (B, T, D, H, C are static Python ints via closure).
#   x      : (T*B, D)  time-major flattened input (row = t*B + b)
#   wih0   : (D, H)    W_ih0^T
#   whh0   : (H, H)    W_hh0^T
#   w1     : (2H, H)   [W_ih1^T ; W_hh1^T]  (fused layer-1 operand)
#   wfc    : (H, C)    W_fc^T
#   b0     : (1, H)    b_ih0 + b_hh0
#   b1     : (1, H)    b_ih1 + b_hh1
#   bfc    : (1, C)    b_fc
#   out    : (T*B, C)  FC(h1) for every (t, b) row
# ---------------------------------------------------------------------------
def _build_rnn_call(B, T, D, H, C):
    def kernel(x_ref, wih0_ref, whh0_ref, w1_ref, wfc_ref,
               b0_ref, b1_ref, bfc_ref, out_ref, xp_scr, h1_scr):
        # Hoisted layer-0 input projection over all T*B rows (single MXU pass).
        xp_scr[...] = (
            jnp.dot(x_ref[...], wih0_ref[...],
                    preferred_element_type=jnp.float32)
            + b0_ref[...]
        )

        whh0 = whh0_ref[...]
        w1 = w1_ref[...]
        # Hoist the bias broadcast out of the time loop.
        b1 = jnp.broadcast_to(b1_ref[...], (B, H))

        def step(t, carry):
            h0, h1 = carry
            r = pl.multiple_of(t * B, B)
            # layer 0: only the recurrent matmul remains inside the loop
            h0 = jnp.tanh(
                xp_scr[pl.ds(r, B), :]
                + jnp.dot(h0, whh0, preferred_element_type=jnp.float32)
            )
            # layer 1: single fused MXU pass over the concatenated operands
            h1 = jnp.tanh(
                jnp.dot(jnp.concatenate([h0, h1], axis=-1), w1,
                        preferred_element_type=jnp.float32)
                + b1
            )
            h1_scr[pl.ds(r, B), :] = h1
            return (h0, h1)

        init = (
            jnp.zeros((B, H), jnp.float32),
            jnp.zeros((B, H), jnp.float32),
        )
        jax.lax.fori_loop(0, T, step, init, unroll=True)

        # FC head over all T*B rows in one MXU pass, straight from VMEM scratch.
        out_ref[...] = (
            jnp.dot(h1_scr[...], wfc_ref[...],
                    preferred_element_type=jnp.float32)
            + bfc_ref[...]
        )

    return pl.pallas_call(
        kernel,
        out_shape=jax.ShapeDtypeStruct((T * B, C), jnp.float32),
        grid_spec=pltpu.PrefetchScalarGridSpec(
            num_scalar_prefetch=0,
            grid=(1,),
            in_specs=[
                pl.BlockSpec((T * B, D), lambda i: (0, 0)),
                pl.BlockSpec((D, H), lambda i: (0, 0)),
                pl.BlockSpec((H, H), lambda i: (0, 0)),
                pl.BlockSpec((2 * H, H), lambda i: (0, 0)),
                pl.BlockSpec((H, C), lambda i: (0, 0)),
                pl.BlockSpec((1, H), lambda i: (0, 0)),
                pl.BlockSpec((1, H), lambda i: (0, 0)),
                pl.BlockSpec((1, C), lambda i: (0, 0)),
            ],
            out_specs=pl.BlockSpec((T * B, C), lambda i: (0, 0)),
            scratch_shapes=[
                pltpu.VMEM((T * B, H), jnp.float32),   # projected inputs
                pltpu.VMEM((T * B, H), jnp.float32),   # layer-1 hidden states
            ],
        ),
        compiler_params=pltpu.CompilerParams(
            dimension_semantics=("arbitrary",),   # time recurrence is sequential
        ),
    )


# ---------------------------------------------------------------------------
# Forward pass matching nn.RNN(tanh, n_layers=2, batch_first=True) + nn.Linear
# ---------------------------------------------------------------------------
def rnn_forward(x, params):
    """x: (B, T, input_size) -> (B, T, n_classes)."""
    x = x.astype(jnp.float32)
    B, T, D = x.shape
    H = params["whh0_t"].shape[0]
    C = params["wfc_t"].shape[1]

    # fused layer-1 weight: [W_ih1^T ; W_hh1^T] -> (2H, H)
    w1_cat = jnp.concatenate([params["wih1_t"], params["whh1_t"]], axis=0)

    # time-major flat input: row index = t*B + b  (tiny XLA transpose)
    x_tm = jnp.transpose(x, (1, 0, 2)).reshape(T * B, D)

    call = _build_rnn_call(B, T, D, H, C)
    out2d = call(x_tm, params["wih0_t"], params["whh0_t"], w1_cat,
                 params["wfc_t"], params["b0"], params["b1"], params["bfc"])

    return jnp.transpose(out2d.reshape(T, B, C), (1, 0, 2))


def init_params(key, input_size, hidden_size, n_classes):
    """Deterministic synthetic parameters (PyTorch-style uniform init bounds)."""
    ks = jax.random.split(key, 10)
    bound = 1.0 / jnp.sqrt(jnp.float32(hidden_size))
    u = lambda k, shape: jax.random.uniform(
        k, shape, jnp.float32, minval=-bound, maxval=bound)

    w_ih0 = u(ks[0], (hidden_size, input_size))
    w_hh0 = u(ks[1], (hidden_size, hidden_size))
    b_ih0 = u(ks[2], (hidden_size,))
    b_hh0 = u(ks[3], (hidden_size,))
    w_ih1 = u(ks[4], (hidden_size, hidden_size))
    w_hh1 = u(ks[5], (hidden_size, hidden_size))
    b_ih1 = u(ks[6], (hidden_size,))
    b_hh1 = u(ks[7], (hidden_size,))
    w_fc = u(ks[8], (n_classes, hidden_size))
    b_fc = u(ks[9], (n_classes,))

    return {
        "wih0_t": w_ih0.T, "whh0_t": w_hh0.T, "b0": (b_ih0 + b_hh0)[None, :],
        "wih1_t": w_ih1.T, "whh1_t": w_hh1.T, "b1": (b_ih1 + b_hh1)[None, :],
        "wfc_t": w_fc.T, "bfc": b_fc[None, :],
    }


def rnn_reference(x, params):
    """Pure-JAX reference matching nn.RNN(tanh) + nn.Linear semantics."""
    x = x.astype(jnp.float32)
    B, T, D = x.shape
    H = params["whh0_t"].shape[0]

    def step(carry, x_t):
        h0, h1 = carry
        h0 = jnp.tanh(x_t @ params["wih0_t"] + h0 @ params["whh0_t"] + params["b0"])
        h1 = jnp.tanh(h0 @ params["wih1_t"] + h1 @ params["whh1_t"] + params["b1"])
        y = h1 @ params["wfc_t"] + params["bfc"]
        return (h0, h1), y

    init = (jnp.zeros((B, H), jnp.float32), jnp.zeros((B, H), jnp.float32))
    _, ys = jax.lax.scan(step, init, jnp.transpose(x, (1, 0, 2)))
    return jnp.transpose(ys, (1, 0, 2))


if __name__ == "__main__":
    B, T = 2, 8
    input_size, hidden_size, n_classes = 16, 32, 3

    key = jax.random.PRNGKey(0)
    k_x, k_p = jax.random.split(key)
    x = jax.random.normal(k_x, (B, T, input_size), jnp.float32)
    params = init_params(k_p, input_size, hidden_size, n_classes)

    out = jax.jit(rnn_forward)(x, params)
    out = jax.block_until_ready(out)

    ref = rnn_reference(x, params)
    assert out.shape == (B, T, n_classes)
    assert jnp.allclose(out, ref, atol=1e-4, rtol=1e-4), "mismatch vs reference"

    print("KERNEL_OK")
</pallas_src>

<mosaic_0001>
module attributes {stable_mosaic.version = 11 : i64} {
  func.func @kernel(%arg0: i32, %arg1: memref<16x16xf32, #tpu.memory_space<vmem>>, %arg2: memref<16x32xf32, #tpu.memory_space<vmem>>, %arg3: memref<32x32xf32, #tpu.memory_space<vmem>>, %arg4: memref<64x32xf32, #tpu.memory_space<vmem>>, %arg5: memref<32x3xf32, #tpu.memory_space<vmem>>, %arg6: memref<1x32xf32, #tpu.memory_space<vmem>>, %arg7: memref<1x32xf32, #tpu.memory_space<vmem>>, %arg8: memref<1x3xf32, #tpu.memory_space<vmem>>, %arg9: memref<16x3xf32, #tpu.memory_space<vmem>>, %arg10: memref<16x32xf32, #tpu.memory_space<vmem>>, %arg11: memref<16x32xf32, #tpu.memory_space<vmem>>) attributes {dimension_semantics = [#tpu.dimension_semantics<arbitrary>], iteration_bounds = array<i64: 1>, scalar_prefetch = 0 : i64, scratch_operands = 2 : i64, tpu.core_type = #tpu.core_type<tc>, window_params = [{pipeline_mode = #tpu.pipeline_mode<synchronous>, transform_indices = @transform_0, window_bounds = array<i64: 16, 16>}, {pipeline_mode = #tpu.pipeline_mode<synchronous>, transform_indices = @transform_1, window_bounds = array<i64: 16, 32>}, {pipeline_mode = #tpu.pipeline_mode<synchronous>, transform_indices = @transform_2, window_bounds = array<i64: 32, 32>}, {pipeline_mode = #tpu.pipeline_mode<synchronous>, transform_indices = @transform_3, window_bounds = array<i64: 64, 32>}, {pipeline_mode = #tpu.pipeline_mode<synchronous>, transform_indices = @transform_4, window_bounds = array<i64: 32, 3>}, {pipeline_mode = #tpu.pipeline_mode<synchronous>, transform_indices = @transform_5, window_bounds = array<i64: 1, 32>}, {pipeline_mode = #tpu.pipeline_mode<synchronous>, transform_indices = @transform_6, window_bounds = array<i64: 1, 32>}, {pipeline_mode = #tpu.pipeline_mode<synchronous>, transform_indices = @transform_7, window_bounds = array<i64: 1, 3>}, {pipeline_mode = #tpu.pipeline_mode<synchronous>, transform_indices = @transform_8, window_bounds = array<i64: 16, 3>}]} {
    %c0 = arith.constant 0 : index
    %c0_0 = arith.constant 0 : index
    %0 = vector.load %arg1[%c0, %c0_0] : memref<16x16xf32, #tpu.memory_space<vmem>>, vector<16x16xf32>
    %c0_1 = arith.constant 0 : index
    %c0_2 = arith.constant 0 : index
    %1 = vector.load %arg2[%c0_1, %c0_2] : memref<16x32xf32, #tpu.memory_space<vmem>>, vector<16x32xf32>
    %cst = arith.constant dense<0.000000e+00> : vector<16x32xf32>
    %2 = tpu.matmul %0, %1, %cst {dimension_numbers = #tpu.dot_dimension_numbers<[1], [0], [0], [1], [0, 0, 1, 1], [], []>} : vector<16x16xf32>, vector<16x32xf32>, vector<16x32xf32> -> vector<16x32xf32>
    %c0_3 = arith.constant 0 : index
    %c0_4 = arith.constant 0 : index
    %3 = vector.load %arg6[%c0_3, %c0_4] : memref<1x32xf32, #tpu.memory_space<vmem>>, vector<1x32xf32>
    %4 = vector.broadcast %3 : vector<1x32xf32> to vector<16x32xf32>
    %5 = arith.addf %2, %4 : vector<16x32xf32>
    %c0_5 = arith.constant 0 : index
    %c0_6 = arith.constant 0 : index
    %6 = vector.load %arg10[%c0_5, %c0_6] : memref<16x32xf32, #tpu.memory_space<vmem>>, vector<16x32xf32>
    tpu.vector_store %arg10[%c0_5, %c0_6], %5 {strides = array<i32>} : memref<16x32xf32, #tpu.memory_space<vmem>>, vector<16x32xf32>,
    %c0_7 = arith.constant 0 : index
    %c0_8 = arith.constant 0 : index
    %7 = vector.load %arg3[%c0_7, %c0_8] : memref<32x32xf32, #tpu.memory_space<vmem>>, vector<32x32xf32>
    %c0_9 = arith.constant 0 : index
    %c0_10 = arith.constant 0 : index
    %8 = vector.load %arg4[%c0_9, %c0_10] : memref<64x32xf32, #tpu.memory_space<vmem>>, vector<64x32xf32>
    %c0_11 = arith.constant 0 : index
    %c0_12 = arith.constant 0 : index
    %9 = vector.load %arg7[%c0_11, %c0_12] : memref<1x32xf32, #tpu.memory_space<vmem>>, vector<1x32xf32>
    %10 = vector.shape_cast %9 : vector<1x32xf32> to vector<1x32xf32>
    %11 = vector.broadcast %10 : vector<1x32xf32> to vector<2x32xf32>
    %cst_13 = arith.constant 0.000000e+00 : f32
    %12 = vector.broadcast %cst_13 : f32 to vector<2x32xf32>
    %cst_14 = arith.constant 0.000000e+00 : f32
    %13 = vector.broadcast %cst_14 : f32 to vector<2x32xf32>
    %c0_i32 = arith.constant 0 : i32
    %c2_i32 = arith.constant 2 : i32
    %14 = arith.muli %c0_i32, %c2_i32 : i32
    %15 = tpu.assume_multiple %14, 2 : i32
    %16 = arith.index_cast %15 : i32 to index
    %c0_15 = arith.constant 0 : index
    %17 = vector.load %arg10[%16, %c0_15] : memref<16x32xf32, #tpu.memory_space<vmem>>, vector<2x32xf32>
    %cst_16 = arith.constant dense<0.000000e+00> : vector<2x32xf32>
    %18 = tpu.matmul %12, %7, %cst_16 {dimension_numbers = #tpu.dot_dimension_numbers<[1], [0], [0], [1], [0, 0, 1, 1], [], []>} : vector<2x32xf32>, vector<32x32xf32>, vector<2x32xf32> -> vector<2x32xf32>
    %19 = arith.addf %17, %18 : vector<2x32xf32>
    %20 = math.tanh %19 : vector<2x32xf32>
    %21 = tpu.concatenate %20, %13 in 1 : vector<2x32xf32>, vector<2x32xf32> -> vector<2x64xf32>
    %cst_17 = arith.constant dense<0.000000e+00> : vector<2x32xf32>
    %22 = tpu.matmul %21, %8, %cst_17 {dimension_numbers = #tpu.dot_dimension_numbers<[1], [0], [0], [1], [0, 0, 1, 1], [], []>} : vector<2x64xf32>, vector<64x32xf32>, vector<2x32xf32> -> vector<2x32xf32>
    %23 = arith.addf %22, %11 : vector<2x32xf32>
    %24 = math.tanh %23 : vector<2x32xf32>
    %25 = arith.index_cast %15 : i32 to index
    %c0_18 = arith.constant 0 : index
    %26 = vector.load %arg11[%25, %c0_18] : memref<16x32xf32, #tpu.memory_space<vmem>>, vector<2x32xf32>
    tpu.vector_store %arg11[%25, %c0_18], %24 {strides = array<i32>} : memref<16x32xf32, #tpu.memory_space<vmem>>, vector<2x32xf32>,
    %c1_i32 = arith.constant 1 : i32
    %c2_i32_19 = arith.constant 2 : i32
    %27 = arith.muli %c1_i32, %c2_i32_19 : i32
    %28 = tpu.assume_multiple %27, 2 : i32
    %29 = arith.index_cast %28 : i32 to index
    %c0_20 = arith.constant 0 : index
    %30 = vector.load %arg10[%29, %c0_20] : memref<16x32xf32, #tpu.memory_space<vmem>>, vector<2x32xf32>
    %cst_21 = arith.constant dense<0.000000e+00> : vector<2x32xf32>
    %31 = tpu.matmul %20, %7, %cst_21 {dimension_numbers = #tpu.dot_dimension_numbers<[1], [0], [0], [1], [0, 0, 1, 1], [], []>} : vector<2x32xf32>, vector<32x32xf32>, vector<2x32xf32> -> vector<2x32xf32>
    %32 = arith.addf %30, %31 : vector<2x32xf32>
    %33 = math.tanh %32 : vector<2x32xf32>
    %34 = tpu.concatenate %33, %24 in 1 : vector<2x32xf32>, vector<2x32xf32> -> vector<2x64xf32>
    %cst_22 = arith.constant dense<0.000000e+00> : vector<2x32xf32>
    %35 = tpu.matmul %34, %8, %cst_22 {dimension_numbers = #tpu.dot_dimension_numbers<[1], [0], [0], [1], [0, 0, 1, 1], [], []>} : vector<2x64xf32>, vector<64x32xf32>, vector<2x32xf32> -> vector<2x32xf32>
    %36 = arith.addf %35, %11 : vector<2x32xf32>
    %37 = math.tanh %36 : vector<2x32xf32>
    %38 = arith.index_cast %28 : i32 to index
    %c0_23 = arith.constant 0 : index
    %39 = vector.load %arg11[%38, %c0_23] : memref<16x32xf32, #tpu.memory_space<vmem>>, vector<2x32xf32>
    tpu.vector_store %arg11[%38, %c0_23], %37 {strides = array<i32>} : memref<16x32xf32, #tpu.memory_space<vmem>>, vector<2x32xf32>,
    %c2_i32_24 = arith.constant 2 : i32
    %c2_i32_25 = arith.constant 2 : i32
    %40 = arith.muli %c2_i32_24, %c2_i32_25 : i32
    %41 = tpu.assume_multiple %40, 2 : i32
    %42 = arith.index_cast %41 : i32 to index
    %c0_26 = arith.constant 0 : index
    %43 = vector.load %arg10[%42, %c0_26] : memref<16x32xf32, #tpu.memory_space<vmem>>, vector<2x32xf32>
    %cst_27 = arith.constant dense<0.000000e+00> : vector<2x32xf32>
    %44 = tpu.matmul %33, %7, %cst_27 {dimension_numbers = #tpu.dot_dimension_numbers<[1], [0], [0], [1], [0, 0, 1, 1], [], []>} : vector<2x32xf32>, vector<32x32xf32>, vector<2x32xf32> -> vector<2x32xf32>
    %45 = arith.addf %43, %44 : vector<2x32xf32>
    %46 = math.tanh %45 : vector<2x32xf32>
    %47 = tpu.concatenate %46, %37 in 1 : vector<2x32xf32>, vector<2x32xf32> -> vector<2x64xf32>
    %cst_28 = arith.constant dense<0.000000e+00> : vector<2x32xf32>
    %48 = tpu.matmul %47, %8, %cst_28 {dimension_numbers = #tpu.dot_dimension_numbers<[1], [0], [0], [1], [0, 0, 1, 1], [], []>} : vector<2x64xf32>, vector<64x32xf32>, vector<2x32xf32> -> vector<2x32xf32>
    %49 = arith.addf %48, %11 : vector<2x32xf32>
    %50 = math.tanh %49 : vector<2x32xf32>
    %51 = arith.index_cast %41 : i32 to index
    %c0_29 = arith.constant 0 : index
    %52 = vector.load %arg11[%51, %c0_29] : memref<16x32xf32, #tpu.memory_space<vmem>>, vector<2x32xf32>
    tpu.vector_store %arg11[%51, %c0_29], %50 {strides = array<i32>} : memref<16x32xf32, #tpu.memory_space<vmem>>, vector<2x32xf32>,
    %c3_i32 = arith.constant 3 : i32
    %c2_i32_30 = arith.constant 2 : i32
    %53 = arith.muli %c3_i32, %c2_i32_30 : i32
    %54 = tpu.assume_multiple %53, 2 : i32
    %55 = arith.index_cast %54 : i32 to index
    %c0_31 = arith.constant 0 : index
    %56 = vector.load %arg10[%55, %c0_31] : memref<16x32xf32, #tpu.memory_space<vmem>>, vector<2x32xf32>
    %cst_32 = arith.constant dense<0.000000e+00> : vector<2x32xf32>
    %57 = tpu.matmul %46, %7, %cst_32 {dimension_numbers = #tpu.dot_dimension_numbers<[1], [0], [0], [1], [0, 0, 1, 1], [], []>} : vector<2x32xf32>, vector<32x32xf32>, vector<2x32xf32> -> vector<2x32xf32>
    %58 = arith.addf %56, %57 : vector<2x32xf32>
    %59 = math.tanh %58 : vector<2x32xf32>
    %60 = tpu.concatenate %59, %50 in 1 : vector<2x32xf32>, vector<2x32xf32> -> vector<2x64xf32>
    %cst_33 = arith.constant dense<0.000000e+00> : vector<2x32xf32>
    %61 = tpu.matmul %60, %8, %cst_33 {dimension_numbers = #tpu.dot_dimension_numbers<[1], [0], [0], [1], [0, 0, 1, 1], [], []>} : vector<2x64xf32>, vector<64x32xf32>, vector<2x32xf32> -> vector<2x32xf32>
    %62 = arith.addf %61, %11 : vector<2x32xf32>
    %63 = math.tanh %62 : vector<2x32xf32>
    %64 = arith.index_cast %54 : i32 to index
    %c0_34 = arith.constant 0 : index
    %65 = vector.load %arg11[%64, %c0_34] : memref<16x32xf32, #tpu.memory_space<vmem>>, vector<2x32xf32>
    tpu.vector_store %arg11[%64, %c0_34], %63 {strides = array<i32>} : memref<16x32xf32, #tpu.memory_space<vmem>>, vector<2x32xf32>,
    %c4_i32 = arith.constant 4 : i32
    %c2_i32_35 = arith.constant 2 : i32
    %66 = arith.muli %c4_i32, %c2_i32_35 : i32
    %67 = tpu.assume_multiple %66, 2 : i32
    %68 = arith.index_cast %67 : i32 to index
    %c0_36 = arith.constant 0 : index
    %69 = vector.load %arg10[%68, %c0_36] : memref<16x32xf32, #tpu.memory_space<vmem>>, vector<2x32xf32>
    %cst_37 = arith.constant dense<0.000000e+00> : vector<2x32xf32>
    %70 = tpu.matmul %59, %7, %cst_37 {dimension_numbers = #tpu.dot_dimension_numbers<[1], [0], [0], [1], [0, 0, 1, 1], [], []>} : vector<2x32xf32>, vector<32x32xf32>, vector<2x32xf32> -> vector<2x32xf32>
    %71 = arith.addf %69, %70 : vector<2x32xf32>
    %72 = math.tanh %71 : vector<2x32xf32>
    %73 = tpu.concatenate %72, %63 in 1 : vector<2x32xf32>, vector<2x32xf32> -> vector<2x64xf32>
    %cst_38 = arith.constant dense<0.000000e+00> : vector<2x32xf32>
    %74 = tpu.matmul %73, %8, %cst_38 {dimension_numbers = #tpu.dot_dimension_numbers<[1], [0], [0], [1], [0, 0, 1, 1], [], []>} : vector<2x64xf32>, vector<64x32xf32>, vector<2x32xf32> -> vector<2x32xf32>
    %75 = arith.addf %74, %11 : vector<2x32xf32>
    %76 = math.tanh %75 : vector<2x32xf32>
    %77 = arith.index_cast %67 : i32 to index
    %c0_39 = arith.constant 0 : index
    %78 = vector.load %arg11[%77, %c0_39] : memref<16x32xf32, #tpu.memory_space<vmem>>, vector<2x32xf32>
    tpu.vector_store %arg11[%77, %c0_39], %76 {strides = array<i32>} : memref<16x32xf32, #tpu.memory_space<vmem>>, vector<2x32xf32>,
    %c5_i32 = arith.constant 5 : i32
    %c2_i32_40 = arith.constant 2 : i32
    %79 = arith.muli %c5_i32, %c2_i32_40 : i32
    %80 = tpu.assume_multiple %79, 2 : i32
    %81 = arith.index_cast %80 : i32 to index
    %c0_41 = arith.constant 0 : index
    %82 = vector.load %arg10[%81, %c0_41] : memref<16x32xf32, #tpu.memory_space<vmem>>, vector<2x32xf32>
    %cst_42 = arith.constant dense<0.000000e+00> : vector<2x32xf32>
    %83 = tpu.matmul %72, %7, %cst_42 {dimension_numbers = #tpu.dot_dimension_numbers<[1], [0], [0], [1], [0, 0, 1, 1], [], []>} : vector<2x32xf32>, vector<32x32xf32>, vector<2x32xf32> -> vector<2x32xf32>
    %84 = arith.addf %82, %83 : vector<2x32xf32>
    %85 = math.tanh %84 : vector<2x32xf32>
    %86 = tpu.concatenate %85, %76 in 1 : vector<2x32xf32>, vector<2x32xf32> -> vector<2x64xf32>
    %cst_43 = arith.constant dense<0.000000e+00> : vector<2x32xf32>
    %87 = tpu.matmul %86, %8, %cst_43 {dimension_numbers = #tpu.dot_dimension_numbers<[1], [0], [0], [1], [0, 0, 1, 1], [], []>} : vector<2x64xf32>, vector<64x32xf32>, vector<2x32xf32> -> vector<2x32xf32>
    %88 = arith.addf %87, %11 : vector<2x32xf32>
    %89 = math.tanh %88 : vector<2x32xf32>
    %90 = arith.index_cast %80 : i32 to index
    %c0_44 = arith.constant 0 : index
    %91 = vector.load %arg11[%90, %c0_44] : memref<16x32xf32, #tpu.memory_space<vmem>>, vector<2x32xf32>
    tpu.vector_store %arg11[%90, %c0_44], %89 {strides = array<i32>} : memref<16x32xf32, #tpu.memory_space<vmem>>, vector<2x32xf32>,
    %c6_i32 = arith.constant 6 : i32
    %c2_i32_45 = arith.constant 2 : i32
    %92 = arith.muli %c6_i32, %c2_i32_45 : i32
    %93 = tpu.assume_multiple %92, 2 : i32
    %94 = arith.index_cast %93 : i32 to index
    %c0_46 = arith.constant 0 : index
    %95 = vector.load %arg10[%94, %c0_46] : memref<16x32xf32, #tpu.memory_space<vmem>>, vector<2x32xf32>
    %cst_47 = arith.constant dense<0.000000e+00> : vector<2x32xf32>
    %96 = tpu.matmul %85, %7, %cst_47 {dimension_numbers = #tpu.dot_dimension_numbers<[1], [0], [0], [1], [0, 0, 1, 1], [], []>} : vector<2x32xf32>, vector<32x32xf32>, vector<2x32xf32> -> vector<2x32xf32>
    %97 = arith.addf %95, %96 : vector<2x32xf32>
    %98 = math.tanh %97 : vector<2x32xf32>
    %99 = tpu.concatenate %98, %89 in 1 : vector<2x32xf32>, vector<2x32xf32> -> vector<2x64xf32>
    %cst_48 = arith.constant dense<0.000000e+00> : vector<2x32xf32>
    %100 = tpu.matmul %99, %8, %cst_48 {dimension_numbers = #tpu.dot_dimension_numbers<[1], [0], [0], [1], [0, 0, 1, 1], [], []>} : vector<2x64xf32>, vector<64x32xf32>, vector<2x32xf32> -> vector<2x32xf32>
    %101 = arith.addf %100, %11 : vector<2x32xf32>
    %102 = math.tanh %101 : vector<2x32xf32>
    %103 = arith.index_cast %93 : i32 to index
    %c0_49 = arith.constant 0 : index
    %104 = vector.load %arg11[%103, %c0_49] : memref<16x32xf32, #tpu.memory_space<vmem>>, vector<2x32xf32>
    tpu.vector_store %arg11[%103, %c0_49], %102 {strides = array<i32>} : memref<16x32xf32, #tpu.memory_space<vmem>>, vector<2x32xf32>,
    %c7_i32 = arith.constant 7 : i32
    %c2_i32_50 = arith.constant 2 : i32
    %105 = arith.muli %c7_i32, %c2_i32_50 : i32
    %106 = tpu.assume_multiple %105, 2 : i32
    %107 = arith.index_cast %106 : i32 to index
    %c0_51 = arith.constant 0 : index
    %108 = vector.load %arg10[%107, %c0_51] : memref<16x32xf32, #tpu.memory_space<vmem>>, vector<2x32xf32>
    %cst_52 = arith.constant dense<0.000000e+00> : vector<2x32xf32>
    %109 = tpu.matmul %98, %7, %cst_52 {dimension_numbers = #tpu.dot_dimension_numbers<[1], [0], [0], [1], [0, 0, 1, 1], [], []>} : vector<2x32xf32>, vector<32x32xf32>, vector<2x32xf32> -> vector<2x32xf32>
    %110 = arith.addf %108, %109 : vector<2x32xf32>
    %111 = math.tanh %110 : vector<2x32xf32>
    %112 = tpu.concatenate %111, %102 in 1 : vector<2x32xf32>, vector<2x32xf32> -> vector<2x64xf32>
    %cst_53 = arith.constant dense<0.000000e+00> : vector<2x32xf32>
    %113 = tpu.matmul %112, %8, %cst_53 {dimension_numbers = #tpu.dot_dimension_numbers<[1], [0], [0], [1], [0, 0, 1, 1], [], []>} : vector<2x64xf32>, vector<64x32xf32>, vector<2x32xf32> -> vector<2x32xf32>
    %114 = arith.addf %113, %11 : vector<2x32xf32>
    %115 = math.tanh %114 : vector<2x32xf32>
    %116 = arith.index_cast %106 : i32 to index
    %c0_54 = arith.constant 0 : index
    %117 = vector.load %arg11[%116, %c0_54] : memref<16x32xf32, #tpu.memory_space<vmem>>, vector<2x32xf32>
    tpu.vector_store %arg11[%116, %c0_54], %115 {strides = array<i32>} : memref<16x32xf32, #tpu.memory_space<vmem>>, vector<2x32xf32>,
    %c8_i32 = arith.constant 8 : i32
    %c0_55 = arith.constant 0 : index
    %c0_56 = arith.constant 0 : index
    %118 = vector.load %arg11[%c0_55, %c0_56] : memref<16x32xf32, #tpu.memory_space<vmem>>, vector<16x32xf32>
    %c0_57 = arith.constant 0 : index
    %c0_58 = arith.constant 0 : index
    %119 = vector.load %arg5[%c0_57, %c0_58] : memref<32x3xf32, #tpu.memory_space<vmem>>, vector<32x3xf32>
    %cst_59 = arith.constant dense<0.000000e+00> : vector<16x3xf32>
    %120 = tpu.matmul %118, %119, %cst_59 {dimension_numbers = #tpu.dot_dimension_numbers<[1], [0], [0], [1], [0, 0, 1, 1], [], []>} : vector<16x32xf32>, vector<32x3xf32>, vector<16x3xf32> -> vector<16x3xf32>
    %c0_60 = arith.constant 0 : index
    %c0_61 = arith.constant 0 : index
    %121 = vector.load %arg8[%c0_60, %c0_61] : memref<1x3xf32, #tpu.memory_space<vmem>>, vector<1x3xf32>
    %122 = vector.broadcast %121 : vector<1x3xf32> to vector<16x3xf32>
    %123 = arith.addf %120, %122 : vector<16x3xf32>
    %c0_62 = arith.constant 0 : index
    %c0_63 = arith.constant 0 : index
    %124 = vector.load %arg9[%c0_62, %c0_63] : memref<16x3xf32, #tpu.memory_space<vmem>>, vector<16x3xf32>
    tpu.vector_store %arg9[%c0_62, %c0_63], %123 {strides = array<i32>} : memref<16x3xf32, #tpu.memory_space<vmem>>, vector<16x3xf32>,
    return
  }
  func.func @transform_0(%arg0: i32) -> (i32, i32) {
    %c0_i32 = arith.constant 0 : i32
    %c0_i32_0 = arith.constant 0 : i32
    %c0_i32_1 = arith.constant 0 : i32
    return %c0_i32, %c0_i32_0 : i32, i32
  }
  func.func @transform_1(%arg0: i32) -> (i32, i32) {
    %c0_i32 = arith.constant 0 : i32
    %c0_i32_0 = arith.constant 0 : i32
    %c0_i32_1 = arith.constant 0 : i32
    return %c0_i32, %c0_i32_0 : i32, i32
  }
  func.func @transform_2(%arg0: i32) -> (i32, i32) {
    %c0_i32 = arith.constant 0 : i32
    %c0_i32_0 = arith.constant 0 : i32
    %c0_i32_1 = arith.constant 0 : i32
    return %c0_i32, %c0_i32_0 : i32, i32
  }
  func.func @transform_3(%arg0: i32) -> (i32, i32) {
    %c0_i32 = arith.constant 0 : i32
    %c0_i32_0 = arith.constant 0 : i32
    %c0_i32_1 = arith.constant 0 : i32
    return %c0_i32, %c0_i32_0 : i32, i32
  }
  func.func @transform_4(%arg0: i32) -> (i32, i32) {
    %c0_i32 = arith.constant 0 : i32
    %c0_i32_0 = arith.constant 0 : i32
    %c0_i32_1 = arith.constant 0 : i32
    return %c0_i32, %c0_i32_0 : i32, i32
  }
  func.func @transform_5(%arg0: i32) -> (i32, i32) {
    %c0_i32 = arith.constant 0 : i32
    %c0_i32_0 = arith.constant 0 : i32
    %c0_i32_1 = arith.constant 0 : i32
    return %c0_i32, %c0_i32_0 : i32, i32
  }
  func.func @transform_6(%arg0: i32) -> (i32, i32) {
    %c0_i32 = arith.constant 0 : i32
    %c0_i32_0 = arith.constant 0 : i32
    %c0_i32_1 = arith.constant 0 : i32
    return %c0_i32, %c0_i32_0 : i32, i32
  }
  func.func @transform_7(%arg0: i32) -> (i32, i32) {
    %c0_i32 = arith.constant 0 : i32
    %c0_i32_0 = arith.constant 0 : i32
    %c0_i32_1 = arith.constant 0 : i32
    return %c0_i32, %c0_i32_0 : i32, i32
  }
  func.func @transform_8(%arg0: i32) -> (i32, i32) {
    %c0_i32 = arith.constant 0 : i32
    %c0_i32_0 = arith.constant 0 : i32
    %c0_i32_1 = arith.constant 0 : i32
    return %c0_i32, %c0_i32_0 : i32, i32
  }
}

</mosaic_0001>

<bundles_post_ra>
// kernel: rnn_forward.1
= control target key start
LH: loop header
LB: loop body
LE: loop exit
PB: predicated region body
PF: predicated region fallthrough
CT: control target
= control target key end

     0   :  { %vm40_vm0 = vcmask 130048   ;;  %v2099_v3 = vmov 0.0|0.0   ;;  %vm2100_vm1 = vmmov 0   ;;  %v2101_v4 = vmov 0.0   ;;  %s2102_s13 = smov 32   ;;  %s2418_s1 = inlined_call_operand.vmem [shape: f32[16,32], index: 1, kind: input, shape index: {}]   ;;  %s2419_s0 = inlined_call_operand.vmem [shape: f32[16,16], index: 0, kind: input, shape index: {}]   ;;  %s2420_s2 = inlined_call_operand.vmem [shape: f32[32,32], index: 2, kind: input, shape index: {}]   ;;  %s2421_s3 = inlined_call_operand.vmem [shape: f32[64,32], index: 3, kind: input, shape index: {}]   ;;  %s2422_s5 = inlined_call_operand.vmem [shape: f32[1,32], index: 5, kind: input, shape index: {}]   ;;  %s2423_s6 = inlined_call_operand.vmem [shape: f32[1,32], index: 6, kind: input, shape index: {}]   ;;  %s2424_s4 = inlined_call_operand.vmem [shape: f32[32,3], index: 4, kind: input, shape index: {}]   ;;  %s2425_s7 = inlined_call_operand.vmem [shape: f32[1,3], index: 7, kind: input, shape index: {}]   ;;  %s2426_s8 = inlined_call_operand.vmem [shape: f32[16,3], index: 8, kind: output, shape index: {}]  }
   0x1   :  { %v31_v0 = vld [vmem:[%s2418_s1] sm:$0xff]  ;;  %v32_v1 = vld [vmem:[%s2418_s1 + $0x8] sm:$0xff]  ;;  %1911 = vmatprep.subr.bf16.mxu1 %v2099_v3  ;;  %1664 = vmatprep.mubr.msk.f32.mxu1 %vm2100_vm1, %v2101_v4  ;;  %v127_v9 = vld [vmem:[%s2420_s2 + $0x10] sm:$0xff]  ;;  %vm122_vm2 = vcmask 261120   ;;  %vm221_vm3 = vcmask 523264   ;;  %vm296_vm4 = vcmask 254976  }
   0x2   :  { %v29_v2 = vld [vmem:[%s2419_s0] sm:$0xff]  ;;  %v1907_v5 = vpack.c.bf16 %v32_v1, %v31_v0  ;;  %v126_v7 = vld [vmem:[%s2420_s2 + $0x8] sm:$0xff]  ;;  %v128_v10 = vld [vmem:[%s2420_s2 + $0x18] sm:$0xff]  ;;  %vm1498_vm5 = vcmask 23552  }
   0x3   :  { %1653 = vmatprep.mubr.msk.f32.mxu0 %vm40_vm0, %v29_v2  ;;  %v125_v6 = vld [vmem:[%s2420_s2] sm:$0xff]  ;;  %v30_v11 = vld [vmem:[%s2419_s0 + $0x8] sm:$0xff]  ;;  %v2179_v12 = vpack.c.bf16 %v128_v10, %v127_v9  ;;  %v131_v16 = vld [vmem:[%s2421_s3 + $0x10] sm:$0xff] }
   0x4   :  { %v2167_v8 = vpack.c.bf16 %v126_v7, %v125_v6  ;;  %1908 = vmatprep.subr.bf16.mxu0 %v1907_v5  ;;  %v129_v13 = vld [vmem:[%s2421_s3] sm:$0xff]  ;;  %v130_v14 = vld [vmem:[%s2421_s3 + $0x8] sm:$0xff]  ;;  %v132_v17 = vld [vmem:[%s2421_s3 + $0x18] sm:$0xff] }
   0x5   :  { %1910 = vmatpush3.bf16.msra.mxu0 %v1907_v5  ;;  %v2201_v15 = vpack.c.bf16 %v130_v14, %v129_v13  ;;  %v2211_v18 = vpack.c.bf16 %v132_v17, %v131_v16  ;;  %v133_v19 = vld [vmem:[%s2421_s3 + $0x20] sm:$0xff]  ;;  %v134_v20 = vld [vmem:[%s2421_s3 + $0x28] sm:$0xff]  ;;  %v135_v22 = vld [vmem:[%s2421_s3 + $0x30] sm:$0xff] }
   0x6   :  { %1913 = vmatpush3.bf16.msra.mxu1 %v2167_v8  ;;  %1917 = vmatprep.subr.bf16.mxu0 %v2099_v3  ;;  %v2220_v21 = vpack.c.bf16 %v134_v20, %v133_v19  ;;  %v136_v23 = vld [vmem:[%s2421_s3 + $0x38] sm:$0xff]  ;;  %v1505_v25 = vld [vmem:[%s2422_s5] ss:$0 sm:$0xff] }
   0x7   :  { %1914 = vmatprep.subr.bf16.mxu1 %v2099_v3  ;;  %v2230_v24 = vpack.c.bf16 %v136_v23, %v135_v22  ;;  %v2262_v36 = vld [vmem:[%s2423_s6] ss:$0 sm:$0xff] }
   0x8   :  { %1654 = vmatmul.mubr.msk.f32.vlgmr.msra.gmra.mrb[0].mxu0 %vm40_vm0, %v30_v11 }
   0x9   :  { %1683 = vmatprep.mubr.msk.f32.mxu0 %vm2100_vm1, %v2101_v4  ;;  %1919 = vmatpush3.bf16.msra.mxu0 %v2201_v15 }
   0xa   :  { %1916 = vmatpush3.bf16.msra.mxu1 %v2179_v12  ;;  %1920 = vmatprep.subr.bf16.mxu0 %v2099_v3 }
   0xb   :  { %1929 = vmatprep.subr.bf16.mxu1 %v2099_v3 }
   0xd   :  { %1665 = vmatmul.mubr.f32.vlgmr.msra.gmra.mrb[0].mxu1 %v2101_v4  ;;  %1922 = vmatpush3.bf16.msra.mxu0 %v2211_v18 }
   0xe   :  { %1931 = vmatpush3.bf16.msra.mxu1 %v2167_v8  ;;  %1694 = vmatprep.mubr.msk.f32.mxu1 %vm2100_vm1, %v2101_v4 }
   0xf   :  { %1932 = vmatprep.subr.bf16.mxu1 %v2099_v3  ;;  %1923 = vmatprep.subr.bf16.mxu0 %v2099_v3 }
  0x11   :  { %1925 = vmatpush3.bf16.msra.mxu0 %v2220_v21 }
  0x12   :  { %1934 = vmatpush3.bf16.msra.mxu1 %v2179_v12  ;;  %1926 = vmatprep.subr.bf16.mxu0 %v2099_v3 }
  0x13   :  { %1935 = vmatprep.subr.bf16.mxu1 %v2099_v3 }
  0x15   :  { %1928 = vmatpush3.bf16.msra.mxu0 %v2230_v24 }
  0x16   :  { %1947 = vmatprep.subr.bf16.mxu0 %v2099_v3 }
  0xdb   :  { %v1655_v26 = vpop.f32.mrb[0].mxu0 }
  0xdc   :  { %v119_v27 = vadd.f32 %v1655_v26, %v1505_v25  ;;  %v113_v28 = vpop.f32.mrb[1].mxu0 }
  0xdd   :  { %v114_v29 = vadd.f32 %v1505_v25, %v113_v28 }
  0xde   :  { %124 = vst.msk [vmem:[#allocation2 + $0x8] sm:$0xff] %vm122_vm2, %v119_v27 }
  0xdf   :  { %123 = vst.msk [vmem:[#allocation2] sm:$0xff] %vm122_vm2, %v114_v29 }
  0xe0   :  { %v214_v30 = vpop.f32.mrb[0].mxu1 }
  0xe1   :  { %v1666_v31 = vpop.f32.mrb[1].mxu1 }
  0xe5   :  { %v773_v9 = vld [vmem:[#allocation2 + $0x8] sm:$0x3]  ;;  %v931_v25 = vld [vmem:[#allocation2 + $0xa] sm:$0x3] }
  0xe6   :  { %v144_v32 = vld [vmem:[#allocation2] sm:$0x3]  ;;  %v299_v37 = vld [vmem:[#allocation2 + $0x2] sm:$0x3]  ;;  %v457_v48 = vld [vmem:[#allocation2 + $0x4] sm:$0x3] }
  0xe7   :  { %v218_v33 = vadd.f32 %v214_v30, %v144_v32  ;;  %v615_v59 = vld [vmem:[#allocation2 + $0x6] sm:$0x3] }
  0xe9   :  { %2067 = vtanh.f32 %v218_v33 }
  0xf3   :  { %v2068_v34 = vpop.eup %2067 }
  0xf4   :  { %1695 = vmatmul.mubr.msk.f32.vlgmr.msra.gmra.mrb[2].mxu1 %vm122_vm2, %v2068_v34  ;;  %v220_v35 = vsel %vm122_vm2, %v2068_v34, 0.0 }
  0xf5   :  { %1684 = vmatmul.mubr.msk.f32.vlgmr.msra.gmra.mrb[2].mxu0 %vm221_vm3, %v220_v35  ;;  %1937 = vmatpush3.bf16.msra.mxu1 %v2201_v15 }
  0xf6   :  { %1949 = vmatpush3.bf16.msra.mxu0 %v2167_v8  ;;  %1724 = vmatprep.mubr.msk.f32.mxu0 %vm2100_vm1, %v2101_v4 }
  0xf7   :  { %1950 = vmatprep.subr.bf16.mxu0 %v2099_v3  ;;  %1938 = vmatprep.subr.bf16.mxu1 %v2099_v3 }
  0xf8   :  { %1713 = vmatprep.mubr.msk.f32.mxu1 %vm2100_vm1, %v2101_v4 }
  0xf9   :  { %1940 = vmatpush3.bf16.msra.mxu1 %v2211_v18 }
  0xfa   :  { %1952 = vmatpush3.bf16.msra.mxu0 %v2179_v12  ;;  %1941 = vmatprep.subr.bf16.mxu1 %v2099_v3 }
  0xfb   :  { %1953 = vmatprep.subr.bf16.mxu0 %v2099_v3 }
  0xfd   :  { %1943 = vmatpush3.bf16.msra.mxu1 %v2220_v21 }
  0xfe   :  { %1944 = vmatprep.subr.bf16.mxu1 %v2099_v3 }
 0x101   :  { %1946 = vmatpush3.bf16.msra.mxu1 %v2230_v24 }
 0x102   :  { %1965 = vmatprep.subr.bf16.mxu1 %v2099_v3 }
 0x1c7   :  { %v369_v38 = vpop.f32.mrb[2].mxu1 }
 0x1c8   :  { %v373_v39 = vadd.f32 %v369_v38, %v299_v37  ;;  %v291_v40 = vpop.f32.mrb[2].mxu0  ;;  %v1696_v41 = vpop.f32.mrb[3].mxu1  ;;  %v1089_v37 = vld [vmem:[#allocation2 + $0xc] sm:$0x3] }
 0x1c9   :  { %v292_v42 = vadd.f32 %v2262_v36, %v291_v40  ;;  %v1685_v43 = vpop.f32.mrb[3].mxu0 }
 0x1ca   :  { %2069 = vtanh.f32 %v373_v39 }
 0x1cb   :  { %2071 = vtanh.f32 %v292_v42 }
 0x1d4   :  { %v2070_v44 = vpop.eup %2069 }
 0x1d5   :  { %v2072_v45 = vpop.eup %2071  ;;  %1725 = vmatmul.mubr.msk.f32.vlgmr.msra.gmra.mrb[4].mxu0 %vm122_vm2, %v2070_v44 }
 0x1d6   :  { %297 = vst.msk [vmem:[#allocation3] sm:$0x3] %vm296_vm4, %v2072_v45  ;;  %376 = vrot.lane.b32.xlu0 %v2072_v45, %s2102_s13  ;;  %1955 = vmatpush3.bf16.msra.mxu0 %v2201_v15 }
 0x1d7   :  { %1956 = vmatprep.subr.bf16.mxu0 %v2099_v3  ;;  %1743 = vmatprep.mubr.msk.f32.mxu0 %vm2100_vm1, %v2101_v4 }
 0x1da   :  { %1958 = vmatpush3.bf16.msra.mxu0 %v2211_v18 }
 0x1db   :  { %1959 = vmatprep.subr.bf16.mxu0 %v2099_v3 }
 0x1de   :  { %1961 = vmatpush3.bf16.msra.mxu0 %v2220_v21 }
 0x1df   :  { %1962 = vmatprep.subr.bf16.mxu0 %v2099_v3 }
 0x1e2   :  { %1964 = vmatpush3.bf16.msra.mxu0 %v2230_v24 }
 0x1e3   :  { %1983 = vmatprep.subr.bf16.mxu0 %v2099_v3 }
 0x248   :  { %v377_v46 = vpop.permute.xlu0 %376 }
 0x249   :  { %v379_v47 = vsel %vm122_vm2, %v2070_v44, %v377_v46 }
 0x24a   :  { %1714 = vmatmul.mubr.msk.f32.vlgmr.msra.gmra.mrb[4].mxu1 %vm221_vm3, %v379_v47  ;;  %v1247_v47 = vld [vmem:[#allocation2 + $0xe] sm:$0x3] }
 0x24b   :  { %1967 = vmatpush3.bf16.msra.mxu1 %v2167_v8  ;;  %1754 = vmatprep.mubr.msk.f32.mxu1 %vm2100_vm1, %v2101_v4 }
 0x24c   :  { %1968 = vmatprep.subr.bf16.mxu1 %v2099_v3 }
 0x24f   :  { %1970 = vmatpush3.bf16.msra.mxu1 %v2179_v12 }
 0x250   :  { %1971 = vmatprep.subr.bf16.mxu1 %v2099_v3 }
 0x2a8   :  { %v527_v49 = vpop.f32.mrb[4].mxu0 }
 0x2a9   :  { %v531_v50 = vadd.f32 %v527_v49, %v457_v48  ;;  %v1726_v51 = vpop.f32.mrb[5].mxu0 }
 0x2ab   :  { %2073 = vtanh.f32 %v531_v50 }
 0x2b5   :  { %v2074_v52 = vpop.eup %2073 }
 0x2b6   :  { %1755 = vmatmul.mubr.msk.f32.vlgmr.msra.gmra.mrb[6].mxu1 %vm122_vm2, %v2074_v52 }
 0x2b7   :  { %1973 = vmatpush3.bf16.msra.mxu1 %v2201_v15  ;;  %1773 = vmatprep.mubr.msk.f32.mxu1 %vm2100_vm1, %v2101_v4 }
 0x2b8   :  { %1974 = vmatprep.subr.bf16.mxu1 %v2099_v3 }
 0x2bb   :  { %1976 = vmatpush3.bf16.msra.mxu1 %v2211_v18 }
 0x2bc   :  { %1977 = vmatprep.subr.bf16.mxu1 %v2099_v3 }
 0x2bf   :  { %1979 = vmatpush3.bf16.msra.mxu1 %v2220_v21 }
 0x2c0   :  { %1980 = vmatprep.subr.bf16.mxu1 %v2099_v3 }
 0x2c3   :  { %1982 = vmatpush3.bf16.msra.mxu1 %v2230_v24 }
 0x2c4   :  { %2001 = vmatprep.subr.bf16.mxu1 %v2099_v3 }
 0x31d   :  { %v449_v53 = vpop.f32.mrb[4].mxu1 }
 0x31e   :  { %v450_v54 = vadd.f32 %v2262_v36, %v449_v53  ;;  %v1715_v55 = vpop.f32.mrb[5].mxu1  ;;  %v1407_v53 = vld [vmem:[%s2424_s4 + $0x8] sm:$0xff] }
 0x31f   :  { %v1408_v55 = vld [vmem:[%s2424_s4 + $0x10] sm:$0xff] }
 0x320   :  { %2075 = vtanh.f32 %v450_v54 }
 0x32a   :  { %v2076_v56 = vpop.eup %2075 }
 0x32b   :  { %455 = vst.msk [vmem:[#allocation3 + $0x2] sm:$0x3] %vm296_vm4, %v2076_v56  ;;  %534 = vrot.lane.b32.xlu0 %v2076_v56, %s2102_s13  ;;  %v1409_v56 = vld [vmem:[%s2424_s4 + $0x18] sm:$0xff] }
 0x389   :  { %v685_v57 = vpop.f32.mrb[6].mxu1 }
 0x38a   :  { %v1756_v58 = vpop.f32.mrb[7].mxu1  ;;  %v689_v60 = vadd.f32 %v685_v57, %v615_v59  ;;  %v2059_v57 = vpack.c.bf16 %v1409_v56, %v1408_v55 }
 0x38c   :  { %2077 = vtanh.f32 %v689_v60 }
 0x396   :  { %v2078_v63 = vpop.eup %2077 }
 0x39d   :  { %v535_v61 = vpop.permute.xlu0 %534 }
 0x39e   :  { %v537_v62 = vsel %vm122_vm2, %v2074_v52, %v535_v61  ;;  %v1406_v52 = vld [vmem:[%s2424_s4] sm:$0xff] }
 0x39f   :  { %1744 = vmatmul.mubr.msk.f32.vlgmr.msra.gmra.mrb[6].mxu0 %vm221_vm3, %v537_v62  ;;  %v2055_v54 = vpack.c.bf16 %v1407_v53, %v1406_v52 }
 0x3a0   :  { %1985 = vmatpush3.bf16.msra.mxu0 %v2167_v8  ;;  %1784 = vmatprep.mubr.msk.f32.mxu0 %vm2100_vm1, %v2101_v4 }
 0x3a1   :  { %1986 = vmatprep.subr.bf16.mxu0 %v2099_v3 }
 0x3a4   :  { %1988 = vmatpush3.bf16.msra.mxu0 %v2179_v12 }
 0x3a5   :  { %1989 = vmatprep.subr.bf16.mxu0 %v2099_v3 }
 0x3a7   :  { %1785 = vmatmul.mubr.msk.f32.vlgmr.msra.gmra.mrb[8].mxu0 %vm122_vm2, %v2078_v63 }
 0x3a8   :  { %1991 = vmatpush3.bf16.msra.mxu0 %v2201_v15  ;;  %1803 = vmatprep.mubr.msk.f32.mxu0 %vm2100_vm1, %v2101_v4 }
 0x3a9   :  { %1992 = vmatprep.subr.bf16.mxu0 %v2099_v3 }
 0x3ac   :  { %1994 = vmatpush3.bf16.msra.mxu0 %v2211_v18 }
 0x3ad   :  { %1995 = vmatprep.subr.bf16.mxu0 %v2099_v3 }
 0x3b0   :  { %1997 = vmatpush3.bf16.msra.mxu0 %v2220_v21 }
 0x3b1   :  { %1998 = vmatprep.subr.bf16.mxu0 %v2099_v3 }
 0x3b4   :  { %2000 = vmatpush3.bf16.msra.mxu0 %v2230_v24 }
 0x3b5   :  { %2019 = vmatprep.subr.bf16.mxu0 %v2099_v3 }
 0x472   :  { %v607_v0 = vpop.f32.mrb[6].mxu0 }
 0x473   :  { %v608_v1 = vadd.f32 %v2262_v36, %v607_v0  ;;  %v1745_v2 = vpop.f32.mrb[7].mxu0 }
 0x475   :  { %2079 = vtanh.f32 %v608_v1 }
 0x47a   :  { %v843_v5 = vpop.f32.mrb[8].mxu0 }
 0x47b   :  { %v1786_v6 = vpop.f32.mrb[9].mxu0  ;;  %v847_v10 = vadd.f32 %v843_v5, %v773_v9 }
 0x47d   :  { %2081 = vtanh.f32 %v847_v10 }
 0x47f   :  { %v2080_v7 = vpop.eup %2079 }
 0x480   :  { %613 = vst.msk [vmem:[#allocation3 + $0x4] sm:$0x3] %vm296_vm4, %v2080_v7  ;;  %692 = vrot.lane.b32.xlu1 %v2080_v7, %s2102_s13 }
 0x487   :  { %v2082_v14 = vpop.eup %2081 }
 0x4f2   :  { %v693_v11 = vpop.permute.xlu1 %692 }
 0x4f3   :  { %v695_v13 = vsel %vm122_vm2, %v2078_v63, %v693_v11  ;;  %v1524_v63 = vld [vmem:[%s2425_s7] ss:$0 sm:$0xff] }
 0x4f4   :  { %1774 = vmatmul.mubr.msk.f32.vlgmr.msra.gmra.mrb[8].mxu1 %vm221_vm3, %v695_v13 }
 0x4f5   :  { %2003 = vmatpush3.bf16.msra.mxu1 %v2167_v8  ;;  %1814 = vmatprep.mubr.msk.f32.mxu1 %vm2100_vm1, %v2101_v4 }
 0x4f6   :  { %2004 = vmatprep.subr.bf16.mxu1 %v2099_v3 }
 0x4f9   :  { %2006 = vmatpush3.bf16.msra.mxu1 %v2179_v12 }
 0x4fa   :  { %2007 = vmatprep.subr.bf16.mxu1 %v2099_v3 }
 0x4fc   :  { %1815 = vmatmul.mubr.msk.f32.vlgmr.msra.gmra.mrb[10].mxu1 %vm122_vm2, %v2082_v14 }
 0x4fd   :  { %2009 = vmatpush3.bf16.msra.mxu1 %v2201_v15  ;;  %1833 = vmatprep.mubr.msk.f32.mxu1 %vm2100_vm1, %v2101_v4 }
 0x4fe   :  { %2010 = vmatprep.subr.bf16.mxu1 %v2099_v3 }
 0x501   :  { %2012 = vmatpush3.bf16.msra.mxu1 %v2211_v18 }
 0x502   :  { %2013 = vmatprep.subr.bf16.mxu1 %v2099_v3 }
 0x505   :  { %2015 = vmatpush3.bf16.msra.mxu1 %v2220_v21 }
 0x506   :  { %2016 = vmatprep.subr.bf16.mxu1 %v2099_v3 }
 0x509   :  { %2018 = vmatpush3.bf16.msra.mxu1 %v2230_v24 }
 0x50a   :  { %2037 = vmatprep.subr.bf16.mxu1 %v2099_v3 }
 0x5c7   :  { %v765_v16 = vpop.f32.mrb[8].mxu1 }
 0x5c8   :  { %v766_v17 = vadd.f32 %v2262_v36, %v765_v16  ;;  %v1775_v19 = vpop.f32.mrb[9].mxu1 }
 0x5ca   :  { %2083 = vtanh.f32 %v766_v17 }
 0x5cf   :  { %v1001_v20 = vpop.f32.mrb[10].mxu1 }
 0x5d0   :  { %v1816_v22 = vpop.f32.mrb[11].mxu1  ;;  %v1005_v26 = vadd.f32 %v1001_v20, %v931_v25 }
 0x5d2   :  { %2085 = vtanh.f32 %v1005_v26 }
 0x5d4   :  { %v2084_v23 = vpop.eup %2083 }
 0x5d5   :  { %771 = vst.msk [vmem:[#allocation3 + $0x6] sm:$0x3] %vm296_vm4, %v2084_v23  ;;  %850 = vrot.lane.b32.xlu1 %v2084_v23, %s2102_s13 }
 0x5dc   :  { %v2086_v29 = vpop.eup %2085 }
 0x647   :  { %v851_v27 = vpop.permute.xlu1 %850 }
 0x648   :  { %v853_v28 = vsel %vm122_vm2, %v2082_v14, %v851_v27 }
 0x649   :  { %1804 = vmatmul.mubr.msk.f32.vlgmr.msra.gmra.mrb[10].mxu0 %vm221_vm3, %v853_v28 }
 0x64a   :  { %2021 = vmatpush3.bf16.msra.mxu0 %v2167_v8  ;;  %1844 = vmatprep.mubr.msk.f32.mxu0 %vm2100_vm1, %v2101_v4 }
 0x64b   :  { %2022 = vmatprep.subr.bf16.mxu0 %v2099_v3 }
 0x64e   :  { %2024 = vmatpush3.bf16.msra.mxu0 %v2179_v12 }
 0x64f   :  { %2025 = vmatprep.subr.bf16.mxu0 %v2099_v3 }
 0x651   :  { %1845 = vmatmul.mubr.msk.f32.vlgmr.msra.gmra.mrb[12].mxu0 %vm122_vm2, %v2086_v29 }
 0x652   :  { %2027 = vmatpush3.bf16.msra.mxu0 %v2201_v15  ;;  %1863 = vmatprep.mubr.msk.f32.mxu0 %vm2100_vm1, %v2101_v4 }
 0x653   :  { %2028 = vmatprep.subr.bf16.mxu0 %v2099_v3 }
 0x656   :  { %2030 = vmatpush3.bf16.msra.mxu0 %v2211_v18 }
 0x657   :  { %2031 = vmatprep.subr.bf16.mxu0 %v2099_v3 }
 0x65a   :  { %2033 = vmatpush3.bf16.msra.mxu0 %v2220_v21 }
 0x65b   :  { %2034 = vmatprep.subr.bf16.mxu0 %v2099_v3 }
 0x65e   :  { %2036 = vmatpush3.bf16.msra.mxu0 %v2230_v24 }
 0x65f   :  { %2056 = vmatprep.subr.bf16.mxu0 %v2055_v54 }
 0x71c   :  { %v923_v30 = vpop.f32.mrb[10].mxu0 }
 0x71d   :  { %v924_v31 = vadd.f32 %v2262_v36, %v923_v30  ;;  %v1805_v32 = vpop.f32.mrb[11].mxu0 }
 0x71f   :  { %2087 = vtanh.f32 %v924_v31 }
 0x724   :  { %v1159_v33 = vpop.f32.mrb[12].mxu0 }
 0x725   :  { %v1846_v34 = vpop.f32.mrb[13].mxu0  ;;  %v1163_v38 = vadd.f32 %v1159_v33, %v1089_v37 }
 0x727   :  { %2089 = vtanh.f32 %v1163_v38 }
 0x729   :  { %v2088_v35 = vpop.eup %2087 }
 0x72a   :  { %929 = vst.msk [vmem:[#allocation3 + $0x8] sm:$0x3] %vm296_vm4, %v2088_v35  ;;  %1008 = vrot.lane.b32.xlu0 %v2088_v35, %s2102_s13 }
 0x731   :  { %v2090_v41 = vpop.eup %2089 }
 0x79c   :  { %v1009_v39 = vpop.permute.xlu0 %1008 }
 0x79d   :  { %v1011_v40 = vsel %vm122_vm2, %v2086_v29, %v1009_v39 }
 0x79e   :  { %1834 = vmatmul.mubr.msk.f32.vlgmr.msra.gmra.mrb[12].mxu1 %vm221_vm3, %v1011_v40 }
 0x79f   :  { %2039 = vmatpush3.bf16.msra.mxu1 %v2167_v8  ;;  %1874 = vmatprep.mubr.msk.f32.mxu1 %vm2100_vm1, %v2101_v4 }
 0x7a0   :  { %2040 = vmatprep.subr.bf16.mxu1 %v2099_v3 }
 0x7a3   :  { %2042 = vmatpush3.bf16.msra.mxu1 %v2179_v12 }
 0x7a4   :  { %2043 = vmatprep.subr.bf16.mxu1 %v2099_v3 }
 0x7a6   :  { %1875 = vmatmul.mubr.msk.f32.vlgmr.msra.gmra.mrb[14].mxu1 %vm122_vm2, %v2090_v41 }
 0x7a7   :  { %2045 = vmatpush3.bf16.msra.mxu1 %v2201_v15  ;;  %1893 = vmatprep.mubr.msk.f32.mxu1 %vm2100_vm1, %v2101_v4 }
 0x7a8   :  { %2046 = vmatprep.subr.bf16.mxu1 %v2099_v3 }
 0x7ab   :  { %2048 = vmatpush3.bf16.msra.mxu1 %v2211_v18 }
 0x7ac   :  { %2049 = vmatprep.subr.bf16.mxu1 %v2099_v3 }
 0x7af   :  { %2051 = vmatpush3.bf16.msra.mxu1 %v2220_v21 }
 0x7b0   :  { %2052 = vmatprep.subr.bf16.mxu1 %v2099_v3  ;;  %v1404_v3 = vld [vmem:[#allocation3] sm:$0xff] }
 0x7b3   :  { %2054 = vmatpush3.bf16.msra.mxu1 %v2230_v24 }
 0x871   :  { %v1081_v8 = vpop.f32.mrb[12].mxu1 }
 0x872   :  { %v1082_v12 = vadd.f32 %v2262_v36, %v1081_v8  ;;  %v1835_v42 = vpop.f32.mrb[13].mxu1 }
 0x874   :  { %2091 = vtanh.f32 %v1082_v12 }
 0x879   :  { %v1317_v15 = vpop.f32.mrb[14].mxu1 }
 0x87a   :  { %v1876_v43 = vpop.f32.mrb[15].mxu1  ;;  %v1321_v48 = vadd.f32 %v1317_v15, %v1247_v47 }
 0x87e   :  { %v2092_v4 = vpop.eup %2091 }
 0x87f   :  { %1087 = vst.msk [vmem:[#allocation3 + $0xa] sm:$0x3] %vm296_vm4, %v2092_v4  ;;  %1166 = vrot.lane.b32.xlu1 %v2092_v4, %s2102_s13 }
 0x8f1   :  { %v1167_v18 = vpop.permute.xlu1 %1166 }
 0x8f2   :  { %v1169_v44 = vsel %vm122_vm2, %v2090_v41, %v1167_v18 }
 0x8f3   :  { %1864 = vmatmul.mubr.msk.f32.vlgmr.msra.gmra.mrb[14].mxu0 %vm221_vm3, %v1169_v44 }
 0x8f4   :  { %1904 = vmatprep.mubr.msk.f32.mxu0 %vm122_vm2, %v1404_v3  ;;  %2058 = vmatpush3.bf16.msra.mxu0 %v2055_v54 }
 0x8f5   :  { %2060 = vmatprep.subr.bf16.mxu0 %v2059_v57 }
 0x8f8   :  { %2062 = vmatpush3.bf16.msra.mxu0 %v2059_v57 }
 0x9c6   :  { %v1239_v21 = vpop.f32.mrb[14].mxu0 }
 0x9c7   :  { %v1240_v24 = vadd.f32 %v2262_v36, %v1239_v21  ;;  %v1865_v45 = vpop.f32.mrb[15].mxu0 }
 0x9c9   :  { %2093 = vtanh.f32 %v1240_v24 }
 0x9ca   :  { %2095 = vtanh.f32 %v1321_v48 }
 0x9d3   :  { %v2094_v46 = vpop.eup %2093 }
 0x9d4   :  { %1245 = vst.msk [vmem:[#allocation3 + $0xc] sm:$0x3] %vm296_vm4, %v2094_v46  ;;  %1324 = vrot.lane.b32.xlu0 %v2094_v46, %s2102_s13  ;;  %v2096_v49 = vpop.eup %2095 }
 0xa46   :  { %v1325_v50 = vpop.permute.xlu0 %1324 }
 0xa47   :  { %v1327_v51 = vsel %vm122_vm2, %v2096_v49, %v1325_v50 }
 0xa48   :  { %1894 = vmatmul.mubr.msk.f32.vlgmr.msra.gmra.mrb[16].mxu1 %vm221_vm3, %v1327_v51 }
 0xb1b   :  { %v1397_v58 = vpop.f32.mrb[16].mxu1 }
 0xb1c   :  { %v1398_v59 = vadd.f32 %v2262_v36, %v1397_v58  ;;  %v1895_v60 = vpop.f32.mrb[17].mxu1 }
 0xb1e   :  { %2097 = vtanh.f32 %v1398_v59 }
 0xb28   :  { %v2098_v61 = vpop.eup %2097 }
 0xb29   :  { %1403 = vst.msk [vmem:[#allocation3 + $0xe] sm:$0x3] %vm296_vm4, %v2098_v61 }
 0xb30   :  { %v1405_v62 = vld [vmem:[#allocation3 + $0x8] sm:$0xff] }
 0xb31   :  { %1905 = vmatmul.mubr.msk.f32.vlgmr.msra.gmra.mrb[16].mxu0 %vm122_vm2, %v1405_v62 }
 0xc04   :  { %v1906_v0 = vpop.f32.mrb[16].mxu0 }
 0xc05   :  { %v1495_v1 = vadd.f32 %v1906_v0, %v1524_v63  ;;  %v1489_v2 = vpop.f32.mrb[17].mxu0 }
 0xc06   :  { %v1490_v5 = vadd.f32 %v1524_v63, %v1489_v2 }
 0xc07   :  { %1500 = vst.msk [vmem:[%s2426_s8 + $0x8] sm:$0xff] %vm1498_vm5, %v1495_v1 }
 0xc08   :  { %1499 = vst.msk [vmem:[%s2426_s8] sm:$0xff] %vm1498_vm5, %v1490_v5 }

</bundles_post_ra>
